<compile_context>
chip_gen: v7x
topology: tpu7x:2x2x1
jax: 0.10.0
libtpu: 0.0.40
codegen_flags: <defaults>
</compile_context>

<pallas_src>
import functools

import jax
import jax.numpy as jnp
from jax.experimental import pallas as pl
from jax.experimental.pallas import tpu as pltpu

_BN_EPS = 1e-5


# =============================================================================
# Pallas kernel: one lane tile (TN points) through the whole VointFormer.
# =============================================================================
def _vointformer_kernel(
    x_ref,        # (1, C_in, V0*TN) bf16  raw point features, real views as lane blocks
    m_ref,        # (1, 1,   V*TN)   f32   binary mask lanes; real views first, cls last
    w0_ref, b0_ref,        # input embedder        (C, C_in) bf16, (C, 1) f32
    w1_ref, b1_ref,        # embed_layers          (L, D, C) bf16, (L, D, 1) f32
    w2v_ref, b2v_ref,      # qkv value chunk       (L, C, D) bf16, (L, C, 1) f32
    w3_ref, b3_ref,        # to_out                (L, C, C) bf16, (L, C, 1) f32
    w4_ref, b4_ref,        # feedforward           (L, C, C) bf16, (L, C, 1) f32
    wc_ref,                # classifier            (Cout, C) bf16
    out_ref,      # (1, Cout, TN) f32  classifier output at the cls view
    *, trim_to_cls: bool,
):
    f32, bf16 = jnp.float32, jnp.bfloat16
    C = w0_ref.shape[0]
    L = w1_ref.shape[0]
    TN = out_ref.shape[2]

    def conv_block(w, b, xin, m):
        # Folded VointConv block: Conv1x1 -> eval BatchNorm -> ReLU with a
        # reset_voint_mask after every stage.  With a binary mask and BN folded into
        # (w, b) this is exactly relu((w @ x + b) * mask).  bf16 MXU operands with f32
        # accumulation; the (C_out,1) bias and (1,M) mask stay implicit broadcast
        # operands (never materialized to (C_out, M)).
        y = jnp.dot(w, xin.astype(bf16), preferred_element_type=f32) + b
        if m is not None:
            y = y * m
        return jnp.maximum(y, 0.0)

    if trim_to_cls:
        # Review item: only the cls-view lanes ever reach the classifier (views never
        # mix under the module's einsum, see note below), so run the layer stack on the
        # (C, TN) cls slice only.  cls token = zeros, cls mask == 1 so the mask multiply
        # drops out entirely.  Exact w.r.t. the module output (verified in __main__).
        x = jnp.zeros((C, TN), f32)
        m_loop = None
    else:
        # Full-fidelity path (default): embed the real views and carry all V0+1 view
        # blocks through the layer stack.
        x_in = x_ref[0]                                   # (C_in, M0) bf16
        m_all = m_ref[0]                                  # (1, M)     f32
        M0 = x_in.shape[1]
        emb_in = conv_block(w0_ref[...], b0_ref[...], x_in, m_all[:, :M0])   # (C, M0)
        # cls voint: torch.cat((zeros cls_token, feats), dim=views).  The cls view is
        # kept in the LAST TN lanes (views only couple through the aligned mask, so the
        # ordering is free); its mask lanes are all ones.
        x = jnp.concatenate([emb_in, jnp.zeros((C, TN), f32)], axis=1)       # (C, M)
        m_loop = m_all

    # ---- VointSelfAttention layers (L == 2: keep the static unroll; switch to a
    #      lax.fori_loop indexing w*_ref[l] dynamically once L grows past ~4) ---------
    for l in range(L):
        emb = conv_block(w1_ref[l], b1_ref[l], x, m_loop)           # (D, M)
        v_chunk = conv_block(w2v_ref[l], b2v_ref[l], emb, m_loop)   # (C, M)
        # Reference module:
        #   attn = vointsoftmax(dots, mask[..., None], -1)   # softmax over j, * mask[v]
        #   out  = einsum('b h n v j, b h d n v -> b h n v d', attn, voint_v)
        # 'j' appears only in attn, so out[.., v, :] = (sum_j attn[.., v, j]) *
        # voint_v[.., v] = mask[v] * voint_v[.., v] = voint_v[.., v] because voint_v is
        # already masked, softmax rows sum to 1 and the cls view keeps
        # reset_voint_empty a no-op.  Hence attention == identity on the value chunk;
        # q/k rows are pruned in the wrapper.  Verified vs. the literal JAX port.
        # TODO(synk): if the upstream einsum were '... d n j' (standard attention over
        #             views), a dots/softmax/weighted-sum block would be required here
        #             and the cls-only trim would no longer be valid.
        att_out = v_chunk
        x = x + conv_block(w3_ref[l], b3_ref[l], att_out, m_loop)   # to_out + residual
        x = x + conv_block(w4_ref[l], b4_ref[l], x, m_loop)         # feedforward + res.

    # ---- classifier, only on the cls view (module slices [..., 0]; cls mask == 1) ---
    x_cls = x if trim_to_cls else x[:, x.shape[1] - TN:]
    y = jnp.dot(wc_ref[...], x_cls.astype(bf16), preferred_element_type=f32)
    out_ref[0] = jnp.maximum(y, 0.0).astype(out_ref.dtype)


# =============================================================================
# Wrapper: lane-major bf16 packing + pallas_call
# =============================================================================
def vointformer_forward(voints_feats, voints_mask, folded_params, *,
                        tile_n=512, trim_layers_to_cls=False):
    """voints_feats: (B, C_in, N, V0) f32 (PyTorch layout), voints_mask: (B, N, V0)
    binary.  Returns points_feats: (B, out_size, N) f32."""
    (w0, b0, w1, b1, w2v, b2v, w3, b3, w4, b4, wc) = folded_params
    B, C_in, N, V0 = voints_feats.shape
    V = V0 + 1
    Cout = wc.shape[0]
    P = B * N

    # Lane tile: as large as possible (amortizes the ~0.35us/step grid overhead and
    # yields long MXU/VPU rows), but keep >= 2 grid steps when the problem allows so
    # the "parallel" axis can shard across both v7x TensorCores (v5e/v6e: harmless).
    max_tn = max(128, (int(tile_n) // 128) * 128)
    tn_two = 128 * pl.cdiv(P, 2 * 128)
    TN = int(max(128, min(max_tn, tn_two)))
    T = int(pl.cdiv(P, TN))
    Pp = T * TN

    # ---- lane-major packing in bf16: points on lanes, views as TN-wide lane blocks --
    # TODO(synk): ideally the producer emits (C_in, V0, B*N) bf16 directly; this
    # transpose is the remaining HBM repack (allow_input_fusion below lets XLA fuse it
    # into the pallas_call input when it can).
    x = jnp.transpose(voints_feats.astype(jnp.bfloat16), (1, 3, 0, 2)).reshape(C_in, V0, P)
    mk = jnp.transpose(voints_mask.astype(jnp.float32), (2, 0, 1)).reshape(V0, P)
    if Pp != P:
        x = jnp.pad(x, ((0, 0), (0, 0), (0, Pp - P)))
        mk = jnp.pad(mk, ((0, 0), (0, Pp - P)))
    # cls view mask == 1 (torch.cat((ones, mask), dim=-1)); stored as the LAST block.
    mk = jnp.concatenate([mk, jnp.ones((1, Pp), jnp.float32)], axis=0)          # (V, Pp)

    x_tiles = x.reshape(C_in, V0, T, TN).transpose(2, 0, 1, 3).reshape(T, C_in, V0 * TN)
    m_tiles = mk.reshape(V, T, TN).transpose(1, 0, 2).reshape(T, 1, V * TN)

    params = (w0, b0, w1, b1, w2v, b2v, w3, b3, w4, b4, wc)

    def _tile_spec(shape):
        blk = (1,) + tuple(shape[1:])
        return pl.BlockSpec(blk, lambda t, _n=len(shape): (t,) + (0,) * (_n - 1))

    def _full_spec(shape):
        return pl.BlockSpec(tuple(shape), lambda t, _n=len(shape): (0,) * _n)

    in_specs = [_tile_spec(x_tiles.shape), _tile_spec(m_tiles.shape)]
    in_specs += [_full_spec(p.shape) for p in params]
    # NOTE: weight specs have constant index maps (DMA'd once).  They are tiny here
    # (<0.1 MiB total); pl.Buffered(1) would reclaim their second buffer for
    # deeper/wider configs.

    # Generation-sized VMEM budget: ~48 MiB on v7x (64 MiB physical), ~96 MiB on
    # v5e/v6e (128 MiB physical).
    try:
        vmem_cap = int(pltpu.get_tpu_info().vmem_capacity_bytes)
    except Exception:
        vmem_cap = 64 * 1024 * 1024
    vmem_limit = int(min(int(0.75 * vmem_cap), 100 * 1024 * 1024))

    kernel = functools.partial(_vointformer_kernel, trim_to_cls=trim_layers_to_cls)
    out = pl.pallas_call(
        kernel,
        grid=(T,),
        in_specs=in_specs,
        out_specs=_tile_spec((T, Cout, TN)),
        out_shape=jax.ShapeDtypeStruct((T, Cout, TN), jnp.float32),
        compiler_params=pltpu.CompilerParams(
            dimension_semantics=("parallel",),
            vmem_limit_bytes=vmem_limit,
            allow_input_fusion=[True, True] + [False] * len(params),
        ),
    )(x_tiles, m_tiles, *params)

    out = out.transpose(1, 0, 2).reshape(Cout, Pp)[:, :P]
    return out.reshape(Cout, B, N).transpose(1, 0, 2)                    # (B, Cout, N)


# =============================================================================
# Parameters: raw (module-shaped) params + eval-mode BN folding / q-k pruning
# =============================================================================
def make_vointformer_params(key, in_size, feat_dim, out_size, depth=2, heads=4):
    """Random parameters mirroring the PyTorch module (un-folded, eval-mode BN)."""
    C, D = feat_dim, feat_dim // heads

    def conv(k, cout, cin):
        return 0.2 * jax.random.normal(k, (cout, cin), jnp.float32)

    def bias(k, cout):
        return 0.1 * jax.random.normal(k, (cout,), jnp.float32)

    def bn(k, cout):
        k1, k2, k3, k4 = jax.random.split(k, 4)
        gamma = 1.0 + 0.1 * jax.random.normal(k1, (cout,), jnp.float32)
        beta = 0.1 * jax.random.normal(k2, (cout,), jnp.float32)
        mean = 0.05 * jax.random.normal(k3, (cout,), jnp.float32)
        var = 1.0 + 0.1 * jnp.abs(jax.random.normal(k4, (cout,), jnp.float32))
        return (gamma, beta, mean, var)

    ki = iter(jax.random.split(key, 4 + 12 * depth))
    embedder = (conv(next(ki), C, in_size), bias(next(ki), C), bn(next(ki), C))
    layers = []
    for _ in range(depth):
        layers.append({
            "embed":  (conv(next(ki), D, C), bias(next(ki), D), bn(next(ki), D)),
            "qkv":    (conv(next(ki), 3 * C, D), bias(next(ki), 3 * C), bn(next(ki), 3 * C)),
            "to_out": (conv(next(ki), C, C), bias(next(ki), C), bn(next(ki), C)),
            "ff":     (conv(next(ki), C, C), bias(next(ki), C), bn(next(ki), C)),
        })
    classifier = conv(next(ki), out_size, C)
    return {"embedder": embedder, "layers": layers, "classifier": classifier}


def _fold_conv_bn(w, b, bn):
    """Fold eval-mode BatchNorm into a 1x1 conv.  Exact w.r.t. the interleaved
    reset_voint_mask calls because the voint mask is binary (m*m == m)."""
    gamma, beta, mean, var = bn
    s = gamma / jnp.sqrt(var + _BN_EPS)
    t = beta - mean * s
    wf = w * s[:, None]
    bf = s * (b if b is not None else 0.0) + t
    return wf, bf[:, None]


def fold_vointformer_params(params, feat_dim, mxu_dtype=jnp.bfloat16):
    """Fold eval-mode BN into each conv, prune the algebraically dead q/k rows of the
    qkv projection, stack per-layer weights, and cast the MXU operands (weights) to
    `mxu_dtype` (bf16 for v5e/v6e/v7x MXU; pass jnp.float32 for bit-parity).  Biases
    stay f32 (added to the f32 accumulator in-kernel)."""
    C = feat_dim
    w0, b0 = _fold_conv_bn(*params["embedder"])
    acc = [[] for _ in range(8)]
    for lp in params["layers"]:
        w1, b1 = _fold_conv_bn(*lp["embed"])
        w2, b2 = _fold_conv_bn(*lp["qkv"])
        # Only the value chunk (rows 2C:3C) of the qkv projection can reach the output
        # under the module's attention einsum; q/k chunks are algebraically dead.
        w2v, b2v = w2[2 * C:3 * C], b2[2 * C:3 * C]
        w3, b3 = _fold_conv_bn(*lp["to_out"])
        w4, b4 = _fold_conv_bn(*lp["ff"])
        for lst, v in zip(acc, (w1, b1, w2v, b2v, w3, b3, w4, b4)):
            lst.append(v)
    s = [jnp.stack(lst, axis=0) for lst in acc]
    w0c, w1c, w2vc, w3c, w4c, wcc = (
        t.astype(mxu_dtype) for t in (w0, s[0], s[2], s[4], s[6], params["classifier"])
    )
    b0f, b1f, b2vf, b3f, b4f = (
        t.astype(jnp.float32) for t in (b0, s[1], s[3], s[5], s[7])
    )
    return (w0c, b0f, w1c, b1f, w2vc, b2vf, w3c, b3f, w4c, b4f, wcc)


# =============================================================================
# Literal pure-JAX reference of the PyTorch forward (for correctness checking)
# =============================================================================
def _reset_mask(f, m):
    return f * m[:, None, :, :]


def _voint_conv_ref(f, m, w, b, bn):
    y = jnp.einsum("oc,bcnv->bonv", w, f)
    if b is not None:
        y = y + b[None, :, None, None]
    y = _reset_mask(y, m)
    if bn is not None:
        gamma, beta, mean, var = bn
        s = gamma / jnp.sqrt(var + _BN_EPS)
        t = beta - mean * s
        y = y * s[None, :, None, None] + t[None, :, None, None]
        y = _reset_mask(y, m)
    y = jnp.maximum(y, 0.0)
    return _reset_mask(y, m)


def vointformer_ref(feats, mask, params, heads=4):
    B, _, N, _ = feats.shape
    mask = mask.astype(jnp.float32)
    x = _voint_conv_ref(feats, mask, *params["embedder"])
    C = x.shape[1]
    D = C // heads
    x = jnp.concatenate([jnp.zeros((B, C, N, 1), x.dtype), x], axis=-1)   # cls first
    m = jnp.concatenate([jnp.ones((B, N, 1), jnp.float32), mask], axis=-1)
    scale = float(C) ** -0.5
    nonempty = (jnp.sum(m, axis=-1) > 0).astype(jnp.float32)              # (B, N)
    for lp in params["layers"]:
        emb = _voint_conv_ref(x, m, *lp["embed"])
        sup = _voint_conv_ref(emb, m, *lp["qkv"])
        chunks = jnp.split(sup, 3, axis=1)
        to_heads = lambda t: t.reshape(B, heads, D, N, -1)
        voint_k, voint_q, voint_v = map(to_heads, chunks)   # same (swapped) naming as forward()
        dots = jnp.einsum("bhdnv,bhdnj->bhnvj", voint_q, voint_k) * scale
        dots = dots * nonempty[:, None, :, None, None]                    # reset_voint_empty
        logits = dots - (1e10 * (1.0 - m))[:, None, :, :, None]           # vointsoftmax penalty
        attn = jax.nn.softmax(logits, axis=-1) * m[:, None, :, :, None]
        out = jnp.einsum("bhnvj,bhdnv->bhnvd", attn, voint_v)             # einsum as written
        out = jnp.transpose(out, (0, 1, 4, 2, 3)).reshape(B, C, N, -1)
        out = out * nonempty[:, None, :, None]                            # reset_voint_empty
        out = _voint_conv_ref(out, m, *lp["to_out"])
        x = x + out
        x = x + _voint_conv_ref(x, m, *lp["ff"])
    y = _voint_conv_ref(x, m, params["classifier"], None, None)
    return y[:, :, :, 0]


# =============================================================================
if __name__ == "__main__":
    key = jax.random.PRNGKey(0)
    B, C_in, N, V0 = 2, 6, 256, 4              # batch, input feat dim, points, views
    feat_dim, heads, depth, out_size = 32, 4, 2, 16

    k_x, k_m, k_p = jax.random.split(key, 3)
    voints_feats = jax.random.normal(k_x, (B, C_in, N, V0), jnp.float32)
    voints_mask = (jax.random.uniform(k_m, (B, N, V0)) > 0.3).astype(jnp.float32)

    params = make_vointformer_params(k_p, C_in, feat_dim, out_size, depth=depth, heads=heads)
    folded = fold_vointformer_params(params, feat_dim)     # bf16 MXU weights, f32 biases

    ref = vointformer_ref(voints_feats, voints_mask, params, heads=heads)
    scale = float(jnp.max(jnp.abs(ref))) + 1e-6

    # Full-fidelity path (all view lanes carried through the layer stack).
    out = vointformer_forward(voints_feats, voints_mask, folded, tile_n=512)
    jax.block_until_ready(out)
    assert out.shape == (B, out_size, N) and out.dtype == jnp.float32
    err = float(jnp.max(jnp.abs(out - ref))) / scale
    assert err < 5e-2, f"kernel vs. literal reference mismatch: normalized err {err}"

    # Review item: cls-only layer stack (exact w.r.t. the module output; ~(V0+1)x less
    # layer-stack work per tile).
    out_trim = vointformer_forward(voints_feats, voints_mask, folded,
                                   tile_n=512, trim_layers_to_cls=True)
    jax.block_until_ready(out_trim)
    err_t = float(jnp.max(jnp.abs(out_trim - ref))) / scale
    assert err_t < 5e-2, f"trimmed kernel vs. reference mismatch: normalized err {err_t}"

    print("KERNEL_OK")
</pallas_src>

<mosaic_0001>
module attributes {stable_mosaic.version = 11 : i64} {
  func.func @_vointformer_kernel(%arg0: i32, %arg1: memref<1x6x1024xbf16, #tpu.memory_space<vmem>>, %arg2: memref<1x1x1280xf32, #tpu.memory_space<vmem>>, %arg3: memref<32x6xbf16, #tpu.memory_space<vmem>>, %arg4: memref<32x1xf32, #tpu.memory_space<vmem>>, %arg5: memref<2x8x32xbf16, #tpu.memory_space<vmem>>, %arg6: memref<2x8x1xf32, #tpu.memory_space<vmem>>, %arg7: memref<2x32x8xbf16, #tpu.memory_space<vmem>>, %arg8: memref<2x32x1xf32, #tpu.memory_space<vmem>>, %arg9: memref<2x32x32xbf16, #tpu.memory_space<vmem>>, %arg10: memref<2x32x1xf32, #tpu.memory_space<vmem>>, %arg11: memref<2x32x32xbf16, #tpu.memory_space<vmem>>, %arg12: memref<2x32x1xf32, #tpu.memory_space<vmem>>, %arg13: memref<16x32xbf16, #tpu.memory_space<vmem>>, %arg14: memref<1x16x256xf32, #tpu.memory_space<vmem>>) attributes {dimension_semantics = [#tpu.dimension_semantics<parallel>], iteration_bounds = array<i64: 2>, scalar_prefetch = 0 : i64, scratch_operands = 0 : i64, tpu.core_type = #tpu.core_type<tc>, window_params = [{transform_indices = @transform_0, window_bounds = array<i64: 1, 6, 1024>}, {transform_indices = @transform_1, window_bounds = array<i64: 1, 1, 1280>}, {pipeline_mode = #tpu.pipeline_mode<synchronous>, transform_indices = @transform_2, window_bounds = array<i64: 32, 6>}, {pipeline_mode = #tpu.pipeline_mode<synchronous>, transform_indices = @transform_3, window_bounds = array<i64: 32, 1>}, {pipeline_mode = #tpu.pipeline_mode<synchronous>, transform_indices = @transform_4, window_bounds = array<i64: 2, 8, 32>}, {pipeline_mode = #tpu.pipeline_mode<synchronous>, transform_indices = @transform_5, window_bounds = array<i64: 2, 8, 1>}, {pipeline_mode = #tpu.pipeline_mode<synchronous>, transform_indices = @transform_6, window_bounds = array<i64: 2, 32, 8>}, {pipeline_mode = #tpu.pipeline_mode<synchronous>, transform_indices = @transform_7, window_bounds = array<i64: 2, 32, 1>}, {pipeline_mode = #tpu.pipeline_mode<synchronous>, transform_indices = @transform_8, window_bounds = array<i64: 2, 32, 32>}, {pipeline_mode = #tpu.pipeline_mode<synchronous>, transform_indices = @transform_9, window_bounds = array<i64: 2, 32, 1>}, {pipeline_mode = #tpu.pipeline_mode<synchronous>, transform_indices = @transform_10, window_bounds = array<i64: 2, 32, 32>}, {pipeline_mode = #tpu.pipeline_mode<synchronous>, transform_indices = @transform_11, window_bounds = array<i64: 2, 32, 1>}, {pipeline_mode = #tpu.pipeline_mode<synchronous>, transform_indices = @transform_12, window_bounds = array<i64: 16, 32>}, {transform_indices = @transform_13, window_bounds = array<i64: 1, 16, 256>}]} {
    %c0 = arith.constant 0 : index
    %c0_0 = arith.constant 0 : index
    %c0_1 = arith.constant 0 : index
    %0 = vector.load %arg1[%c0, %c0_0, %c0_1] : memref<1x6x1024xbf16, #tpu.memory_space<vmem>>, vector<1x6x1024xbf16>
    %1 = vector.shape_cast %0 : vector<1x6x1024xbf16> to vector<6x1024xbf16>
    %c0_2 = arith.constant 0 : index
    %c0_3 = arith.constant 0 : index
    %c0_4 = arith.constant 0 : index
    %2 = vector.load %arg2[%c0_2, %c0_3, %c0_4] : memref<1x1x1280xf32, #tpu.memory_space<vmem>>, vector<1x1x1280xf32>
    %3 = vector.shape_cast %2 : vector<1x1x1280xf32> to vector<1x1280xf32>
    %c0_5 = arith.constant 0 : index
    %c0_6 = arith.constant 0 : index
    %4 = vector.load %arg3[%c0_5, %c0_6] : memref<32x6xbf16, #tpu.memory_space<vmem>>, vector<32x6xbf16>
    %c0_7 = arith.constant 0 : index
    %c0_8 = arith.constant 0 : index
    %5 = vector.load %arg4[%c0_7, %c0_8] : memref<32x1xf32, #tpu.memory_space<vmem>>, vector<32x1xf32>
    %6 = vector.extract_strided_slice %3 {offsets = [0, 0], sizes = [1, 1024], strides = [1, 1]} : vector<1x1280xf32> to vector<1x1024xf32>
    %cst = arith.constant dense<0.000000e+00> : vector<32x1024xf32>
    %7 = tpu.matmul %4, %1, %cst {dimension_numbers = #tpu.dot_dimension_numbers<[1], [0], [0], [1], [0, 0, 1, 1], [], []>} : vector<32x6xbf16>, vector<6x1024xbf16>, vector<32x1024xf32> -> vector<32x1024xf32>
    %8 = vector.broadcast %5 : vector<32x1xf32> to vector<32x1024xf32>
    %9 = arith.addf %7, %8 : vector<32x1024xf32>
    %10 = vector.broadcast %6 : vector<1x1024xf32> to vector<32x1024xf32>
    %11 = arith.mulf %9, %10 : vector<32x1024xf32>
    %cst_9 = arith.constant 0.000000e+00 : f32
    %12 = vector.broadcast %cst_9 : f32 to vector<32x1024xf32>
    %13 = arith.maximumf %11, %12 : vector<32x1024xf32>
    %cst_10 = arith.constant 0.000000e+00 : f32
    %14 = vector.broadcast %cst_10 : f32 to vector<32x256xf32>
    %15 = tpu.concatenate %13, %14 in 1 : vector<32x1024xf32>, vector<32x256xf32> -> vector<32x1280xf32>
    %c0_11 = arith.constant 0 : index
    %c0_12 = arith.constant 0 : index
    %c0_13 = arith.constant 0 : index
    %16 = vector.load %arg5[%c0_11, %c0_12, %c0_13] : memref<2x8x32xbf16, #tpu.memory_space<vmem>>, vector<1x8x32xbf16>
    %17 = vector.shape_cast %16 : vector<1x8x32xbf16> to vector<8x32xbf16>
    %c0_14 = arith.constant 0 : index
    %c0_15 = arith.constant 0 : index
    %c0_16 = arith.constant 0 : index
    %18 = vector.load %arg6[%c0_14, %c0_15, %c0_16] : memref<2x8x1xf32, #tpu.memory_space<vmem>>, vector<1x8x1xf32>
    %19 = vector.shape_cast %18 : vector<1x8x1xf32> to vector<8x1xf32>
    %20 = arith.truncf %15 : vector<32x1280xf32> to vector<32x1280xbf16>
    %cst_17 = arith.constant dense<0.000000e+00> : vector<8x1280xf32>
    %21 = tpu.matmul %17, %20, %cst_17 {dimension_numbers = #tpu.dot_dimension_numbers<[1], [0], [0], [1], [0, 0, 1, 1], [], []>} : vector<8x32xbf16>, vector<32x1280xbf16>, vector<8x1280xf32> -> vector<8x1280xf32>
    %22 = vector.broadcast %19 : vector<8x1xf32> to vector<8x1280xf32>
    %23 = arith.addf %21, %22 : vector<8x1280xf32>
    %24 = vector.broadcast %3 : vector<1x1280xf32> to vector<8x1280xf32>
    %25 = arith.mulf %23, %24 : vector<8x1280xf32>
    %cst_18 = arith.constant 0.000000e+00 : f32
    %26 = vector.broadcast %cst_18 : f32 to vector<8x1280xf32>
    %27 = arith.maximumf %25, %26 : vector<8x1280xf32>
    %c0_19 = arith.constant 0 : index
    %c0_20 = arith.constant 0 : index
    %c0_21 = arith.constant 0 : index
    %28 = vector.load %arg7[%c0_19, %c0_20, %c0_21] : memref<2x32x8xbf16, #tpu.memory_space<vmem>>, vector<1x32x8xbf16>
    %29 = vector.shape_cast %28 : vector<1x32x8xbf16> to vector<32x8xbf16>
    %c0_22 = arith.constant 0 : index
    %c0_23 = arith.constant 0 : index
    %c0_24 = arith.constant 0 : index
    %30 = vector.load %arg8[%c0_22, %c0_23, %c0_24] : memref<2x32x1xf32, #tpu.memory_space<vmem>>, vector<1x32x1xf32>
    %31 = vector.shape_cast %30 : vector<1x32x1xf32> to vector<32x1xf32>
    %32 = arith.truncf %27 : vector<8x1280xf32> to vector<8x1280xbf16>
    %cst_25 = arith.constant dense<0.000000e+00> : vector<32x1280xf32>
    %33 = tpu.matmul %29, %32, %cst_25 {dimension_numbers = #tpu.dot_dimension_numbers<[1], [0], [0], [1], [0, 0, 1, 1], [], []>} : vector<32x8xbf16>, vector<8x1280xbf16>, vector<32x1280xf32> -> vector<32x1280xf32>
    %34 = vector.broadcast %31 : vector<32x1xf32> to vector<32x1280xf32>
    %35 = arith.addf %33, %34 : vector<32x1280xf32>
    %36 = vector.broadcast %3 : vector<1x1280xf32> to vector<32x1280xf32>
    %37 = arith.mulf %35, %36 : vector<32x1280xf32>
    %cst_26 = arith.constant 0.000000e+00 : f32
    %38 = vector.broadcast %cst_26 : f32 to vector<32x1280xf32>
    %39 = arith.maximumf %37, %38 : vector<32x1280xf32>
    %c0_27 = arith.constant 0 : index
    %c0_28 = arith.constant 0 : index
    %c0_29 = arith.constant 0 : index
    %40 = vector.load %arg9[%c0_27, %c0_28, %c0_29] : memref<2x32x32xbf16, #tpu.memory_space<vmem>>, vector<1x32x32xbf16>
    %41 = vector.shape_cast %40 : vector<1x32x32xbf16> to vector<32x32xbf16>
    %c0_30 = arith.constant 0 : index
    %c0_31 = arith.constant 0 : index
    %c0_32 = arith.constant 0 : index
    %42 = vector.load %arg10[%c0_30, %c0_31, %c0_32] : memref<2x32x1xf32, #tpu.memory_space<vmem>>, vector<1x32x1xf32>
    %43 = vector.shape_cast %42 : vector<1x32x1xf32> to vector<32x1xf32>
    %44 = arith.truncf %39 : vector<32x1280xf32> to vector<32x1280xbf16>
    %cst_33 = arith.constant dense<0.000000e+00> : vector<32x1280xf32>
    %45 = tpu.matmul %41, %44, %cst_33 {dimension_numbers = #tpu.dot_dimension_numbers<[1], [0], [0], [1], [0, 0, 1, 1], [], []>} : vector<32x32xbf16>, vector<32x1280xbf16>, vector<32x1280xf32> -> vector<32x1280xf32>
    %46 = vector.broadcast %43 : vector<32x1xf32> to vector<32x1280xf32>
    %47 = arith.addf %45, %46 : vector<32x1280xf32>
    %48 = vector.broadcast %3 : vector<1x1280xf32> to vector<32x1280xf32>
    %49 = arith.mulf %47, %48 : vector<32x1280xf32>
    %cst_34 = arith.constant 0.000000e+00 : f32
    %50 = vector.broadcast %cst_34 : f32 to vector<32x1280xf32>
    %51 = arith.maximumf %49, %50 : vector<32x1280xf32>
    %52 = arith.addf %15, %51 : vector<32x1280xf32>
    %c0_35 = arith.constant 0 : index
    %c0_36 = arith.constant 0 : index
    %c0_37 = arith.constant 0 : index
    %53 = vector.load %arg11[%c0_35, %c0_36, %c0_37] : memref<2x32x32xbf16, #tpu.memory_space<vmem>>, vector<1x32x32xbf16>
    %54 = vector.shape_cast %53 : vector<1x32x32xbf16> to vector<32x32xbf16>
    %c0_38 = arith.constant 0 : index
    %c0_39 = arith.constant 0 : index
    %c0_40 = arith.constant 0 : index
    %55 = vector.load %arg12[%c0_38, %c0_39, %c0_40] : memref<2x32x1xf32, #tpu.memory_space<vmem>>, vector<1x32x1xf32>
    %56 = vector.shape_cast %55 : vector<1x32x1xf32> to vector<32x1xf32>
    %57 = arith.truncf %52 : vector<32x1280xf32> to vector<32x1280xbf16>
    %cst_41 = arith.constant dense<0.000000e+00> : vector<32x1280xf32>
    %58 = tpu.matmul %54, %57, %cst_41 {dimension_numbers = #tpu.dot_dimension_numbers<[1], [0], [0], [1], [0, 0, 1, 1], [], []>} : vector<32x32xbf16>, vector<32x1280xbf16>, vector<32x1280xf32> -> vector<32x1280xf32>
    %59 = vector.broadcast %56 : vector<32x1xf32> to vector<32x1280xf32>
    %60 = arith.addf %58, %59 : vector<32x1280xf32>
    %61 = vector.broadcast %3 : vector<1x1280xf32> to vector<32x1280xf32>
    %62 = arith.mulf %60, %61 : vector<32x1280xf32>
    %cst_42 = arith.constant 0.000000e+00 : f32
    %63 = vector.broadcast %cst_42 : f32 to vector<32x1280xf32>
    %64 = arith.maximumf %62, %63 : vector<32x1280xf32>
    %65 = arith.addf %52, %64 : vector<32x1280xf32>
    %c1 = arith.constant 1 : index
    %c0_43 = arith.constant 0 : index
    %c0_44 = arith.constant 0 : index
    %66 = vector.load %arg5[%c1, %c0_43, %c0_44] : memref<2x8x32xbf16, #tpu.memory_space<vmem>>, vector<1x8x32xbf16>
    %67 = vector.shape_cast %66 : vector<1x8x32xbf16> to vector<8x32xbf16>
    %c1_45 = arith.constant 1 : index
    %c0_46 = arith.constant 0 : index
    %c0_47 = arith.constant 0 : index
    %68 = vector.load %arg6[%c1_45, %c0_46, %c0_47] : memref<2x8x1xf32, #tpu.memory_space<vmem>>, vector<1x8x1xf32>
    %69 = vector.shape_cast %68 : vector<1x8x1xf32> to vector<8x1xf32>
    %70 = arith.truncf %65 : vector<32x1280xf32> to vector<32x1280xbf16>
    %cst_48 = arith.constant dense<0.000000e+00> : vector<8x1280xf32>
    %71 = tpu.matmul %67, %70, %cst_48 {dimension_numbers = #tpu.dot_dimension_numbers<[1], [0], [0], [1], [0, 0, 1, 1], [], []>} : vector<8x32xbf16>, vector<32x1280xbf16>, vector<8x1280xf32> -> vector<8x1280xf32>
    %72 = vector.broadcast %69 : vector<8x1xf32> to vector<8x1280xf32>
    %73 = arith.addf %71, %72 : vector<8x1280xf32>
    %74 = vector.broadcast %3 : vector<1x1280xf32> to vector<8x1280xf32>
    %75 = arith.mulf %73, %74 : vector<8x1280xf32>
    %cst_49 = arith.constant 0.000000e+00 : f32
    %76 = vector.broadcast %cst_49 : f32 to vector<8x1280xf32>
    %77 = arith.maximumf %75, %76 : vector<8x1280xf32>
    %c1_50 = arith.constant 1 : index
    %c0_51 = arith.constant 0 : index
    %c0_52 = arith.constant 0 : index
    %78 = vector.load %arg7[%c1_50, %c0_51, %c0_52] : memref<2x32x8xbf16, #tpu.memory_space<vmem>>, vector<1x32x8xbf16>
    %79 = vector.shape_cast %78 : vector<1x32x8xbf16> to vector<32x8xbf16>
    %c1_53 = arith.constant 1 : index
    %c0_54 = arith.constant 0 : index
    %c0_55 = arith.constant 0 : index
    %80 = vector.load %arg8[%c1_53, %c0_54, %c0_55] : memref<2x32x1xf32, #tpu.memory_space<vmem>>, vector<1x32x1xf32>
    %81 = vector.shape_cast %80 : vector<1x32x1xf32> to vector<32x1xf32>
    %82 = arith.truncf %77 : vector<8x1280xf32> to vector<8x1280xbf16>
    %cst_56 = arith.constant dense<0.000000e+00> : vector<32x1280xf32>
    %83 = tpu.matmul %79, %82, %cst_56 {dimension_numbers = #tpu.dot_dimension_numbers<[1], [0], [0], [1], [0, 0, 1, 1], [], []>} : vector<32x8xbf16>, vector<8x1280xbf16>, vector<32x1280xf32> -> vector<32x1280xf32>
    %84 = vector.broadcast %81 : vector<32x1xf32> to vector<32x1280xf32>
    %85 = arith.addf %83, %84 : vector<32x1280xf32>
    %86 = vector.broadcast %3 : vector<1x1280xf32> to vector<32x1280xf32>
    %87 = arith.mulf %85, %86 : vector<32x1280xf32>
    %cst_57 = arith.constant 0.000000e+00 : f32
    %88 = vector.broadcast %cst_57 : f32 to vector<32x1280xf32>
    %89 = arith.maximumf %87, %88 : vector<32x1280xf32>
    %c1_58 = arith.constant 1 : index
    %c0_59 = arith.constant 0 : index
    %c0_60 = arith.constant 0 : index
    %90 = vector.load %arg9[%c1_58, %c0_59, %c0_60] : memref<2x32x32xbf16, #tpu.memory_space<vmem>>, vector<1x32x32xbf16>
    %91 = vector.shape_cast %90 : vector<1x32x32xbf16> to vector<32x32xbf16>
    %c1_61 = arith.constant 1 : index
    %c0_62 = arith.constant 0 : index
    %c0_63 = arith.constant 0 : index
    %92 = vector.load %arg10[%c1_61, %c0_62, %c0_63] : memref<2x32x1xf32, #tpu.memory_space<vmem>>, vector<1x32x1xf32>
    %93 = vector.shape_cast %92 : vector<1x32x1xf32> to vector<32x1xf32>
    %94 = arith.truncf %89 : vector<32x1280xf32> to vector<32x1280xbf16>
    %cst_64 = arith.constant dense<0.000000e+00> : vector<32x1280xf32>
    %95 = tpu.matmul %91, %94, %cst_64 {dimension_numbers = #tpu.dot_dimension_numbers<[1], [0], [0], [1], [0, 0, 1, 1], [], []>} : vector<32x32xbf16>, vector<32x1280xbf16>, vector<32x1280xf32> -> vector<32x1280xf32>
    %96 = vector.broadcast %93 : vector<32x1xf32> to vector<32x1280xf32>
    %97 = arith.addf %95, %96 : vector<32x1280xf32>
    %98 = vector.broadcast %3 : vector<1x1280xf32> to vector<32x1280xf32>
    %99 = arith.mulf %97, %98 : vector<32x1280xf32>
    %cst_65 = arith.constant 0.000000e+00 : f32
    %100 = vector.broadcast %cst_65 : f32 to vector<32x1280xf32>
    %101 = arith.maximumf %99, %100 : vector<32x1280xf32>
    %102 = arith.addf %65, %101 : vector<32x1280xf32>
    %c1_66 = arith.constant 1 : index
    %c0_67 = arith.constant 0 : index
    %c0_68 = arith.constant 0 : index
    %103 = vector.load %arg11[%c1_66, %c0_67, %c0_68] : memref<2x32x32xbf16, #tpu.memory_space<vmem>>, vector<1x32x32xbf16>
    %104 = vector.shape_cast %103 : vector<1x32x32xbf16> to vector<32x32xbf16>
    %c1_69 = arith.constant 1 : index
    %c0_70 = arith.constant 0 : index
    %c0_71 = arith.constant 0 : index
    %105 = vector.load %arg12[%c1_69, %c0_70, %c0_71] : memref<2x32x1xf32, #tpu.memory_space<vmem>>, vector<1x32x1xf32>
    %106 = vector.shape_cast %105 : vector<1x32x1xf32> to vector<32x1xf32>
    %107 = arith.truncf %102 : vector<32x1280xf32> to vector<32x1280xbf16>
    %cst_72 = arith.constant dense<0.000000e+00> : vector<32x1280xf32>
    %108 = tpu.matmul %104, %107, %cst_72 {dimension_numbers = #tpu.dot_dimension_numbers<[1], [0], [0], [1], [0, 0, 1, 1], [], []>} : vector<32x32xbf16>, vector<32x1280xbf16>, vector<32x1280xf32> -> vector<32x1280xf32>
    %109 = vector.broadcast %106 : vector<32x1xf32> to vector<32x1280xf32>
    %110 = arith.addf %108, %109 : vector<32x1280xf32>
    %111 = vector.broadcast %3 : vector<1x1280xf32> to vector<32x1280xf32>
    %112 = arith.mulf %110, %111 : vector<32x1280xf32>
    %cst_73 = arith.constant 0.000000e+00 : f32
    %113 = vector.broadcast %cst_73 : f32 to vector<32x1280xf32>
    %114 = arith.maximumf %112, %113 : vector<32x1280xf32>
    %115 = arith.addf %102, %114 : vector<32x1280xf32>
    %116 = vector.extract_strided_slice %115 {offsets = [0, 1024], sizes = [32, 256], strides = [1, 1]} : vector<32x1280xf32> to vector<32x256xf32>
    %c0_74 = arith.constant 0 : index
    %c0_75 = arith.constant 0 : index
    %117 = vector.load %arg13[%c0_74, %c0_75] : memref<16x32xbf16, #tpu.memory_space<vmem>>, vector<16x32xbf16>
    %118 = arith.truncf %116 : vector<32x256xf32> to vector<32x256xbf16>
    %cst_76 = arith.constant dense<0.000000e+00> : vector<16x256xf32>
    %119 = tpu.matmul %117, %118, %cst_76 {dimension_numbers = #tpu.dot_dimension_numbers<[1], [0], [0], [1], [0, 0, 1, 1], [], []>} : vector<16x32xbf16>, vector<32x256xbf16>, vector<16x256xf32> -> vector<16x256xf32>
    %cst_77 = arith.constant 0.000000e+00 : f32
    %120 = vector.broadcast %cst_77 : f32 to vector<16x256xf32>
    %121 = arith.maximumf %119, %120 : vector<16x256xf32>
    %c0_78 = arith.constant 0 : index
    %c0_79 = arith.constant 0 : index
    %c0_80 = arith.constant 0 : index
    %122 = vector.load %arg14[%c0_78, %c0_79, %c0_80] : memref<1x16x256xf32, #tpu.memory_space<vmem>>, vector<1x16x256xf32>
    %123 = vector.shape_cast %122 : vector<1x16x256xf32> to vector<16x256xf32>
    %124 = vector.shape_cast %121 : vector<16x256xf32> to vector<1x16x256xf32>
    tpu.vector_store %arg14[%c0_78, %c0_79, %c0_80], %124 {strides = array<i32>} : memref<1x16x256xf32, #tpu.memory_space<vmem>>, vector<1x16x256xf32>,
    return
  }
  func.func @transform_0(%arg0: i32) -> (i32, i32, i32) {
    %c0_i32 = arith.constant 0 : i32
    %c0_i32_0 = arith.constant 0 : i32
    %c0_i32_1 = arith.constant 0 : i32
    return %arg0, %c0_i32, %c0_i32_0 : i32, i32, i32
  }
  func.func @transform_1(%arg0: i32) -> (i32, i32, i32) {
    %c0_i32 = arith.constant 0 : i32
    %c0_i32_0 = arith.constant 0 : i32
    %c0_i32_1 = arith.constant 0 : i32
    return %arg0, %c0_i32, %c0_i32_0 : i32, i32, i32
  }
  func.func @transform_2(%arg0: i32) -> (i32, i32) {
    %c0_i32 = arith.constant 0 : i32
    %c0_i32_0 = arith.constant 0 : i32
    %c0_i32_1 = arith.constant 0 : i32
    return %c0_i32, %c0_i32_0 : i32, i32
  }
  func.func @transform_3(%arg0: i32) -> (i32, i32) {
    %c0_i32 = arith.constant 0 : i32
    %c0_i32_0 = arith.constant 0 : i32
    %c0_i32_1 = arith.constant 0 : i32
    return %c0_i32, %c0_i32_0 : i32, i32
  }
  func.func @transform_4(%arg0: i32) -> (i32, i32, i32) {
    %c0_i32 = arith.constant 0 : i32
    %c0_i32_0 = arith.constant 0 : i32
    %c0_i32_1 = arith.constant 0 : i32
    %c0_i32_2 = arith.constant 0 : i32
    return %c0_i32, %c0_i32_0, %c0_i32_1 : i32, i32, i32
  }
  func.func @transform_5(%arg0: i32) -> (i32, i32, i32) {
    %c0_i32 = arith.constant 0 : i32
    %c0_i32_0 = arith.constant 0 : i32
    %c0_i32_1 = arith.constant 0 : i32
    %c0_i32_2 = arith.constant 0 : i32
    return %c0_i32, %c0_i32_0, %c0_i32_1 : i32, i32, i32
  }
  func.func @transform_6(%arg0: i32) -> (i32, i32, i32) {
    %c0_i32 = arith.constant 0 : i32
    %c0_i32_0 = arith.constant 0 : i32
    %c0_i32_1 = arith.constant 0 : i32
    %c0_i32_2 = arith.constant 0 : i32
    return %c0_i32, %c0_i32_0, %c0_i32_1 : i32, i32, i32
  }
  func.func @transform_7(%arg0: i32) -> (i32, i32, i32) {
    %c0_i32 = arith.constant 0 : i32
    %c0_i32_0 = arith.constant 0 : i32
    %c0_i32_1 = arith.constant 0 : i32
    %c0_i32_2 = arith.constant 0 : i32
    return %c0_i32, %c0_i32_0, %c0_i32_1 : i32, i32, i32
  }
  func.func @transform_8(%arg0: i32) -> (i32, i32, i32) {
    %c0_i32 = arith.constant 0 : i32
    %c0_i32_0 = arith.constant 0 : i32
    %c0_i32_1 = arith.constant 0 : i32
    %c0_i32_2 = arith.constant 0 : i32
    return %c0_i32, %c0_i32_0, %c0_i32_1 : i32, i32, i32
  }
  func.func @transform_9(%arg0: i32) -> (i32, i32, i32) {
    %c0_i32 = arith.constant 0 : i32
    %c0_i32_0 = arith.constant 0 : i32
    %c0_i32_1 = arith.constant 0 : i32
    %c0_i32_2 = arith.constant 0 : i32
    return %c0_i32, %c0_i32_0, %c0_i32_1 : i32, i32, i32
  }
  func.func @transform_10(%arg0: i32) -> (i32, i32, i32) {
    %c0_i32 = arith.constant 0 : i32
    %c0_i32_0 = arith.constant 0 : i32
    %c0_i32_1 = arith.constant 0 : i32
    %c0_i32_2 = arith.constant 0 : i32
    return %c0_i32, %c0_i32_0, %c0_i32_1 : i32, i32, i32
  }
  func.func @transform_11(%arg0: i32) -> (i32, i32, i32) {
    %c0_i32 = arith.constant 0 : i32
    %c0_i32_0 = arith.constant 0 : i32
    %c0_i32_1 = arith.constant 0 : i32
    %c0_i32_2 = arith.constant 0 : i32
    return %c0_i32, %c0_i32_0, %c0_i32_1 : i32, i32, i32
  }
  func.func @transform_12(%arg0: i32) -> (i32, i32) {
    %c0_i32 = arith.constant 0 : i32
    %c0_i32_0 = arith.constant 0 : i32
    %c0_i32_1 = arith.constant 0 : i32
    return %c0_i32, %c0_i32_0 : i32, i32
  }
  func.func @transform_13(%arg0: i32) -> (i32, i32, i32) {
    %c0_i32 = arith.constant 0 : i32
    %c0_i32_0 = arith.constant 0 : i32
    %c0_i32_1 = arith.constant 0 : i32
    return %arg0, %c0_i32, %c0_i32_0 : i32, i32, i32
  }
}

</mosaic_0001>

<bundles_post_ra>
// kernel: tpu_custom_call.1
= control target key start
LH: loop header
LB: loop body
LE: loop exit
PB: predicated region body
PF: predicated region fallthrough
CT: control target
= control target key end

     0   :  { %18 = vsyncpa [#allocation3], 0  ;;  %s2131_s0 = inlined_call_operand.vmem [shape: bf16[2,6,1024], index: 0, kind: input, shape index: {}]   ;;  %s2132_s1 = inlined_call_operand.vmem [shape: f32[2,1,1280], index: 1, kind: input, shape index: {}]   ;;  %s2133_s2 = inlined_call_operand.vmem [shape: bf16[32,6], index: 2, kind: input, shape index: {}]   ;;  %s2134_s3 = inlined_call_operand.vmem [shape: f32[32,1], index: 3, kind: input, shape index: {}]   ;;  %s2135_s4 = inlined_call_operand.vmem [shape: bf16[2,8,32], index: 4, kind: input, shape index: {}]   ;;  %s2136_s5 = inlined_call_operand.vmem [shape: f32[2,8,1], index: 5, kind: input, shape index: {}]   ;;  %s2137_s6 = inlined_call_operand.vmem [shape: bf16[2,32,8], index: 6, kind: input, shape index: {}]   ;;  %s2138_s7 = inlined_call_operand.vmem [shape: f32[2,32,1], index: 7, kind: input, shape index: {}]   ;;  %s2139_s8 = inlined_call_operand.vmem [shape: bf16[2,32,32], index: 8, kind: input, shape index: {}]   ;;  %s2140_s9 = inlined_call_operand.vmem [shape: f32[2,32,1], index: 9, kind: input, shape index: {}]   ;;  %s2141_s10 = inlined_call_operand.vmem [shape: bf16[2,32,32], index: 10, kind: input, shape index: {}]   ;;  %s2142_s11 = inlined_call_operand.vmem [shape: f32[2,32,1], index: 11, kind: input, shape index: {}]   ;;  %s2143_s12 = inlined_call_operand.vmem [shape: bf16[16,32], index: 12, kind: input, shape index: {}]   ;;  %s2144_s13 = inlined_call_operand.hbm [shape: f32[2,16,256], index: 13, kind: output, shape index: {}]  }
   0x1   :  { %20 = vsyncpa [#allocation3 + $0x1], 0  ;;  %s1767_s22 = smov 0   ;;  %s1769_s23 = smov 0  }
   0x2   :  { %s1771_s24 = smov 0   ;;  %s1773_s25 = smov 0  }
   0x3 LB: > { %s1788_s26 = sadd.s32 4294967295, %s1688_s25   ;;  %s1490_s27 = sadd.s32 4294967294, %s1688_s25   ;;  %s1688_s25 = sphi %s1773_s25, %s2150_s25   ;;  %s1684_s24 = sphi %s1771_s24, %s2149_s24   ;;  %s1680_s23 = sphi %s1769_s23, %s2148_s23   ;;  %s1676_s22 = sphi %s1767_s22, %s2147_s22  }
   0x4   : > { %s1792_s28 = sadd.s32 1, %s1688_s25   ;;  %s316_s0 = sadd.s32 1, %s1684_s24 }
   0x5   : > { %s313_s29 = ssub.s32 %s1688_s25, %s1792_s28  ;;  %p326_p0 = scmp.ne.s32.totalorder %s1684_s24, %s1680_s23 }
   0x6   : > { %p314_p1 = scmp.eq.s32.totalorder %s313_s29, 0  ;;  %p327_p2 = scmp.eq.s32.totalorder %s1788_s26, 1 }
   0x7   : > { %p332_p3 = scmp.ne.s32.totalorder %s1680_s23, %s1676_s22  ;;  %p333_p4 = scmp.eq.s32.totalorder %s1490_s27, 1 }
   0x8   : > { %s1803_s30 = scalar_select %p314_p1, %s1684_s24, %s316_s0  }
   0x9   : > { %p1805_p5 = por %p327_p2, %p326_p0  ;;  %p1809_p6 = por %p333_p4, %p332_p3 }
   0xa   : > { %p1493_p7 = scmp.ge.s32.totalorder %s1688_s25, 1  ;;  %p399_p8 = scmp.lt.s32.totalorder %s1688_s25, 3 }
   0xc   : > { %p400_p9 = pnand %p1493_p7, %p399_p8 }
   0xd   : > { %v1690_v0 = vmov (!%p400_p9), 0.0   ;;  %vm1691_vm0 = vmmov (!%p400_p9), 0   ;;  %v459_v1 = vld [vmem:[%s2136_s5] sm:$0xff] (!%p400_p9)  ;;  %v1692_v2 = vmov (!%p400_p9), 0.0|0.0   ;;  %vm466_vm1 = vcmask (!%p400_p9), 261120   ;;  %v533_v6 = vld [vmem:[%s2138_s7 + $0x18] sm:$0xff] (!%p400_p9) }
   0xe   : > { %403 = sbr.rel (%p400_p9) target bundleno = 2115 (0x843), region = 72  ;;  %1559 = vmatprep.subr.bf16.mxu0 (!%p400_p9), %v1690_v0  ;;  %1561 = vmatprep.mubr.msk.bf16.mxu0 (!%p400_p9), %vm1691_vm0, %v1690_v0  ;;  %v458_v3 = vld [vmem:[%s2135_s4] sm:$0xf] (!%p400_p9)  ;;  %v1693_v4 = vmov (!%p400_p9), 0   ;;  %v654_v7 = vld [vmem:[%s2140_s9 + $0x8] sm:$0xff] (!%p400_p9)  ;;  %v656_v8 = vld [vmem:[%s2140_s9 + $0x18] sm:$0xff] (!%p400_p9)  ;;  %v512_v19 = vlaneseq (!%p400_p9) }
   0xf   : > { %1560 = vmatpush3.bf16.msra.mxu0 (!%p400_p9), %v1692_v2  ;;  %1611 = vset.pattern.permute.xlu0 (!%p400_p9), %v1693_v4  ;;  %v530_v5 = vld [vmem:[%s2138_s7] sm:$0xff] (!%p400_p9)  ;;  %v779_v9 = vld [vmem:[%s2142_s11 + $0x8] sm:$0xff] (!%p400_p9)  ;;  %v781_v10 = vld [vmem:[%s2142_s11 + $0x18] sm:$0xff] (!%p400_p9)  ;;  %p452_p10 = scmp.lt.s32.totalorder (!%p400_p9), %s1788_s26, 1  ;;  %vm573_vm2 = vcmask (!%p400_p9), 1043456   ;;  %vm566_vm3 = vcmask (!%p400_p9), 64512  }
  0x10   : > { %463 = vperm.xlu0 (!%p400_p9), %1611, %v459_v1   ;;  %612 = vmatprep.mubr.bf16.mxu1 (!%p400_p9), %v1693_v4  ;;  %v1516_v11 = vld [vmem:[%s2138_s7 + $0x20] sm:$0xff] (!%p400_p9)  ;;  %v1518_v12 = vld [vmem:[%s2138_s7 + $0x30] sm:$0xff] (!%p400_p9)  ;;  %v531_v17 = vld [vmem:[%s2138_s7 + $0x8] sm:$0xff] (!%p400_p9)  ;;  %v513_v21 = vshrl.u32 (!%p400_p9), %v512_v19, 7  ;;  %s1556_s17 = sshll.u32 (!%p400_p9), %s1788_s26, 9  ;;  %s1694_s27 = smov (!%p400_p9), [#allocation2]  }
  0x11   : > { %1612 = vset.pattern.permute.xlu1 (!%p400_p9), %v1693_v4  ;;  %v1529_v13 = vld [vmem:[%s2140_s9 + $0x20] sm:$0xff] (!%p400_p9)  ;;  %v1531_v14 = vld [vmem:[%s2140_s9 + $0x30] sm:$0xff] (!%p400_p9)  ;;  %v1510_v30 = vld [vmem:[%s2136_s5 + $0x8] sm:$0xff] (!%p400_p9)  ;;  %s2088_s20 = scalar_lea.hbm (!%p400_p9), %s2144_s13, %s1556_s17  ;;  %s1630_s0 = sshll.u32 (!%p400_p9), %s1694_s27, 4  ;;  %s1631_s0 = int_to_ptr.vmem [resolvable:$false] %s1630_s0 }
  0x12   : > { %1562 = vmatmul.mubr.msk.bf16.vlgmr.msra.gmra.mrb[0].mxu0 (!%p400_p9), %vm466_vm1, %v458_v3  ;;  %v1541_v15 = vld [vmem:[%s2142_s11 + $0x20] sm:$0xff] (!%p400_p9)  ;;  %v1543_v16 = vld [vmem:[%s2142_s11 + $0x30] sm:$0xff] (!%p400_p9)  ;;  %543 = vperm.xlu1 (!%p400_p9), %1612, %v531_v17   ;;  %v518_v23 = vsub.s32 (!%p400_p9), 1, %v513_v21  ;;  %v1517_v33 = vld [vmem:[%s2138_s7 + $0x28] sm:$0xff] (!%p400_p9)  ;;  %v514_v39 = vsub.s32 (!%p400_p9), 0, %v513_v21 }
  0x13   : > { %729 = vmatprep.mubr.bf16.mxu0 (!%p400_p9), %v1693_v4  ;;  %v532_v18 = vld [vmem:[%s2138_s7 + $0x10] sm:$0xff] (!%p400_p9)  ;;  %v653_v20 = vld [vmem:[%s2140_s9] sm:$0xff] (!%p400_p9)  ;;  %v1519_v34 = vld [vmem:[%s2138_s7 + $0x38] sm:$0xff] (!%p400_p9) }
  0x14   : > { %538 = vperm.xlu0 (!%p400_p9), %1611, %v530_v5   ;;  %v655_v22 = vld [vmem:[%s2140_s9 + $0x10] sm:$0xff] (!%p400_p9)  ;;  %v778_v24 = vld [vmem:[%s2142_s11] sm:$0xff] (!%p400_p9)  ;;  %v1530_v35 = vld [vmem:[%s2140_s9 + $0x28] sm:$0xff] (!%p400_p9) }
  0x15   : > { %s453_s29 = scalar_select %p452_p10, %s1788_s26, 1  ;;  %v780_v27 = vld [vmem:[%s2142_s11 + $0x10] sm:$0xff]  ;;  %v1532_v36 = vld [vmem:[%s2140_s9 + $0x38] sm:$0xff]  ;;  %v1542_v37 = vld [vmem:[%s2142_s11 + $0x28] sm:$0xff] }
  0x16   : > { %548 = vperm.xlu1 %1612, %v532_v18   ;;  %v1544_v38 = vld [vmem:[%s2142_s11 + $0x38] sm:$0xff]  ;;  %v1613_v50 = vld [vmem:[%s2137_s6] sm:$0xff]   ;;  %v1614_v51 = vld [vmem:[%s2137_s6 + $0x8] sm:$0xff]  }
  0x17   : > { %s1565_s16 = smul.u32 10, %s453_s29  ;;  %s444_s29 = sand.u32 1, %s1680_s23  }
  0x18   : > { %553 = vperm.xlu0 %1611, %v533_v6   ;;  %s1494_s15 = sshll.u32 %s444_s29, 5  ;;  %s2090_s26 = scalar_lea.sflag [#allocation3], %s444_s29 }
  0x19   : > { %s455_s21 = scalar_lea.vmem %s2132_s1, %s1565_s16  ;;  %s446_s3 = scalar_lea.vmem [#allocation2], %s1494_s15 }
  0x1a   : > { %663 = vperm.xlu1 %1612, %v653_v20   ;;  %v457_v25 = vld [vmem:[%s455_s21 + $0x8] sm:$0x3]  ;;  %s1416_s16 = sshll.u32 %s446_s3, 4  ;;  %s1632_s15 = scalar_lea.vmem %s1631_s0, 1024  ;;  %s2083_s16 = int_to_ptr.vmem [resolvable:$true] %s1416_s16 }
  0x1b   : > { %v1882_v26 = vrot.slane %v457_v25, %v518_v23  ;;  %v1910_v40 = vrot.slane %v457_v25, %v514_v39  ;;  %s1626_s21 = scalar_lea.vmem %s2083_s16, 512  ;;  %p1633_p0 = scmp.lt.s32.totalorder %s2083_s16, %s1631_s0 }
  0x1c   : > { %668 = vperm.xlu0 %1611, %v654_v7   ;;  %p1627_p11 = scmp.ne.s32.totalorder %s2083_s16, %s1626_s21  ;;  %p1634_p1 = scmp.lt.s32.totalorder %s1632_s15, %s1626_s21 }
  0x1e   : > { %673 = vperm.xlu1 %1612, %v655_v22   ;;  %p1628_p12 = pnand %p1627_p11, %p1805_p5  ;;  %p1635_p2 = por %p1634_p1, %p1633_p0 }
  0x20   : > { %678 = vperm.xlu0 %1611, %v656_v8   ;;  %p1629_p13 = pneg %p1628_p12 }
  0x22   : > { %788 = vperm.xlu1 %1612, %v778_v24   ;;  %p1636_p3 = pnand %p1635_p2, %p1629_p13 }
  0x24   : > { %793 = vperm.xlu0 %1611, %v779_v9  }
  0x26   : > { %798 = vperm.xlu1 %1612, %v780_v27  }
  0x28   : > { %803 = vperm.xlu0 %1611, %v781_v10  }
  0x2a   : > { %909 = vperm.xlu1 %1612, %v1510_v30   ;;  %v1615_v30 = vld [vmem:[%s2139_s8] sm:$0xff]  }
  0x2c   : > { %974 = vperm.xlu0 %1611, %v1516_v11  }
  0x2e   : > { %979 = vperm.xlu1 %1612, %v1517_v33  }
  0x30   : > { %984 = vperm.xlu0 %1611, %v1518_v12  }
  0x32   : > { %989 = vperm.xlu1 %1612, %v1519_v34  }
  0x34   : > { %1099 = vperm.xlu0 %1611, %v1529_v13  }
  0x36   : > { %1104 = vperm.xlu1 %1612, %v1530_v35  }
  0x38   : > { %1109 = vperm.xlu0 %1611, %v1531_v14  }
  0x3a   : > { %1114 = vperm.xlu1 %1612, %v1532_v36  }
  0x3c   : > { %1226 = vperm.xlu0 %1611, %v1541_v15  }
  0x3e   : > { %1231 = vperm.xlu1 %1612, %v1542_v37  }
  0x40   : > { %1236 = vperm.xlu0 %1611, %v1543_v16  }
  0x42   : > { %1241 = vperm.xlu1 %1612, %v1544_v38  }
  0x8f   : > { %v464_v28 = vpop.permute.xlu0 %463 }
  0x90   : > { %v523_v29 = vmul.f32 %v1882_v26, %v464_v28 }
  0x91   : > { %v544_v56 = vpop.permute.xlu1 %543 }
  0x92   : > { %v525_v31 = vmax.f32 %v523_v29, 0.0 }
  0x93   : > { %v539_v52 = vpop.permute.xlu0 %538 }
  0x94   : > { %v535_v32 = vpack.c.bf16 %v525_v31, %v525_v31  ;;  %v1616_v31 = vld [vmem:[%s2139_s8 + $0x8] sm:$0xff]  }
  0x95   : > { %v549_v5 = vpop.permute.xlu1 %548 }
  0x96   : > { %1498 = vmatprep.subr.msk.bf16.mxu1 %vm573_vm2, %v535_v32 }
  0x97   : > { %v554_v12 = vpop.permute.xlu0 %553 }
  0x99   : > { %v664_v32 = vpop.permute.xlu1 %663 }
  0x9b   : > { %v669_v36 = vpop.permute.xlu0 %668 }
  0xe5   : > { %v504_v41 = vpop.f32.mrb[0].mxu0 }
  0xe6   : > { %v505_v42 = vadd.f32 %v504_v41, %v464_v28  ;;  %v1563_v43 = vpop.f32.mrb[1].mxu0 }
  0xe7   : > { %v508_v44 = vpop.f32.mrb[2].mxu0 }
  0xe8   : > { %v522_v45 = vmul.f32 %v1910_v40, %v505_v42  ;;  %v1564_v46 = vpop.f32.mrb[3].mxu0 }
  0xea   : > { %v524_v47 = vmax.f32 %v522_v45, 0.0 }
  0xec   : > { %v534_v48 = vpack.c.bf16 %v524_v47, %v524_v47 }
  0xee   : > { %v575_v49 = vsel %vm573_vm2, %v534_v48, 0  ;;  %v674_v48 = vpop.permute.xlu1 %673 }
  0xef   : > { %581 = vmatpush1.bf16.msra.mxu1 %v575_v49 }
  0xf2   : > { %1499 = vmatmul.mubr.msk.bf16.vlgmr.msra.gmra.mrb[0].mxu1 %vm566_vm3, %v1613_v50 }
  0xf3   : > { %622 = vmatprep.mubr.bf16.mxu1 %v1693_v4 }
  0xfa   : > { %1500 = vmatmul.mubr.msk.bf16.gmra.mrb[4].mxu1 %vm566_vm3, %v1614_v51 }
  0xfb   : > { %854 = vmatprep.mubr.bf16.mxu1 %v1693_v4 }
 0x1c5   : > { %v614_v53 = vpop.f32.mrb[0].mxu1 }
 0x1c6   : > { %v615_v54 = vadd.f32 %v614_v53, %v539_v52  ;;  %v616_v55 = vpop.f32.mrb[1].mxu1 }
 0x1c7   : > { %v617_v57 = vadd.f32 %v616_v55, %v539_v52  ;;  %v618_v58 = vpop.f32.mrb[2].mxu1  ;;  %v679_v55 = vpop.permute.xlu0 %678 }
 0x1c8   : > { %v633_v59 = vmul.f32 %v615_v54, %v1910_v40  ;;  %v619_v60 = vadd.f32 %v618_v58, %v544_v56  ;;  %v620_v61 = vpop.f32.mrb[3].mxu1 }
 0x1c9   : > { %v634_v62 = vmul.f32 %v617_v57, %v1882_v26  ;;  %v621_v63 = vadd.f32 %v620_v61, %v544_v56 }
 0x1ca   : > { %v635_v0 = vmul.f32 %v619_v60, %v1910_v40  ;;  %v641_v2 = vmax.f32 %v633_v59, 0.0 }
 0x1cb   : > { %v636_v1 = vmul.f32 %v621_v63, %v1882_v26  ;;  %v642_v6 = vmax.f32 %v634_v62, 0.0 }
 0x1cc   : > { %v643_v3 = vmax.f32 %v635_v0, 0.0 }
 0x1cd   : > { %v644_v7 = vmax.f32 %v636_v1, 0.0  ;;  %v624_v8 = vpop.f32.mrb[4].mxu1 }
 0x1ce   : > { %v657_v9 = vpack.c.bf16 %v643_v3, %v641_v2  ;;  %v625_v10 = vadd.f32 %v624_v8, %v549_v5  ;;  %v626_v11 = vpop.f32.mrb[5].mxu1 }
 0x1cf   : > { %v627_v13 = vadd.f32 %v626_v11, %v549_v5  ;;  %v628_v14 = vpop.f32.mrb[6].mxu1  ;;  %v658_v15 = vpack.c.bf16 %v644_v7, %v642_v6  ;;  %v1618_v11 = vld [vmem:[%s2141_s10 + $0x8] sm:$0xff]  }
 0x1d0   : > { %v637_v16 = vmul.f32 %v625_v10, %v1910_v40  ;;  %v629_v17 = vadd.f32 %v628_v14, %v554_v12  ;;  %v630_v18 = vpop.f32.mrb[7].mxu1  ;;  %v1617_v10 = vld [vmem:[%s2141_s10] sm:$0xff]  }
 0x1d1   : > { %v638_v19 = vmul.f32 %v627_v13, %v1882_v26  ;;  %v631_v20 = vadd.f32 %v630_v18, %v554_v12  ;;  %697 = vmatprep.subr.bf16.mxu0 %v658_v15  ;;  %v789_v12 = vpop.permute.xlu1 %788 }
 0x1d2   : > { %v639_v21 = vmul.f32 %v629_v17, %v1910_v40  ;;  %698 = vmatpush1.bf16.msra.mxu0 %v657_v9  ;;  %v645_v23 = vmax.f32 %v637_v16, 0.0  ;;  %v794_v16 = vpop.permute.xlu0 %793 }
 0x1d3   : > { %v640_v22 = vmul.f32 %v631_v20, %v1882_v26  ;;  %v646_v25 = vmax.f32 %v638_v19, 0.0 }
 0x1d4   : > { %v647_v24 = vmax.f32 %v639_v21, 0.0 }
 0x1d5   : > { %v648_v27 = vmax.f32 %v640_v22, 0.0 }
 0x1d6   : > { %v659_v28 = vpack.c.bf16 %v647_v24, %v645_v23 }
 0x1d7   : > { %v660_v29 = vpack.c.bf16 %v648_v27, %v646_v25 }
 0x1d9   : > { %699 = vmatprep.subr.bf16.mxu0 %v660_v29 }
 0x1da   : > { %700 = vmatpush1.bf16.msra.mxu0 %v659_v28 }
 0x1dd   : > { %1503 = vmatmul.mubr.msk.bf16.vlgmr.msra.gmra.mrb[4].mxu0 %vm466_vm1, %v1615_v30  ;;  %v799_v30 = vpop.permute.xlu1 %798 }
 0x1de   : > { %739 = vmatprep.mubr.bf16.mxu0 %v1693_v4 }
 0x1e5   : > { %1504 = vmatmul.mubr.msk.bf16.gmra.mrb[8].mxu0 %vm466_vm1, %v1616_v31 }
 0x1e6   : > { %947 = vmatprep.mubr.bf16.mxu0 %v1693_v4 }
 0x2b0   : > { %v731_v33 = vpop.f32.mrb[4].mxu0 }
 0x2b1   : > { %v732_v34 = vadd.f32 %v731_v33, %v664_v32  ;;  %v733_v35 = vpop.f32.mrb[5].mxu0 }
 0x2b2   : > { %v734_v37 = vadd.f32 %v733_v35, %v664_v32  ;;  %v735_v38 = vpop.f32.mrb[6].mxu0 }
 0x2b3   : > { %v736_v39 = vadd.f32 %v735_v38, %v669_v36  ;;  %v737_v41 = vpop.f32.mrb[7].mxu0  ;;  %v1946_v44 = vmul.f32 %v732_v34, %v1910_v40 }
 0x2b4   : > { %v1943_v42 = vmul.f32 %v734_v37, %v1882_v26  ;;  %v738_v43 = vadd.f32 %v737_v41, %v669_v36  ;;  %v804_v36 = vpop.permute.xlu0 %803 }
 0x2b5   : > { %v752_v45 = vmul.f32 %v736_v39, %v1910_v40  ;;  %v758_v52 = vmax.f32 %v1946_v44, 0.0 }
 0x2b6   : > { %v1950_v46 = vmul.f32 %v738_v43, %v1882_v26  ;;  %v759_v49 = vmax.f32 %v1943_v42, 0.0 }
 0x2b7   : > { %v760_v47 = vmax.f32 %v752_v45, 0.0 }
 0x2b8   : > { %v761_v50 = vmax.f32 %v1950_v46, 0.0  ;;  %v741_v51 = vpop.f32.mrb[8].mxu0 }
 0x2b9   : > { %v742_v53 = vadd.f32 %v741_v51, %v674_v48  ;;  %v743_v54 = vpop.f32.mrb[9].mxu0  ;;  %v782_v59 = vpack.c.bf16 %v760_v47, %v758_v52 }
 0x2ba   : > { %v744_v56 = vadd.f32 %v743_v54, %v674_v48  ;;  %v745_v57 = vpop.f32.mrb[10].mxu0  ;;  %v783_v58 = vpack.c.bf16 %v761_v50, %v759_v49 }
 0x2bb   : > { %v746_v60 = vadd.f32 %v745_v57, %v679_v55  ;;  %v747_v61 = vpop.f32.mrb[11].mxu0  ;;  %v1959_v0 = vmul.f32 %v742_v53, %v1910_v40 }
 0x2bc   : > { %v1956_v62 = vmul.f32 %v744_v56, %v1882_v26  ;;  %v748_v63 = vadd.f32 %v747_v61, %v679_v55  ;;  %822 = vmatprep.subr.bf16.mxu1 %v783_v58 }
 0x2bd   : > { %v756_v1 = vmul.f32 %v746_v60, %v1910_v40  ;;  %823 = vmatpush1.bf16.msra.mxu1 %v782_v59  ;;  %v762_v7 = vmax.f32 %v1959_v0, 0.0 }
 0x2be   : > { %v757_v2 = vmul.f32 %v748_v63, %v1882_v26  ;;  %v763_v5 = vmax.f32 %v1956_v62, 0.0  ;;  %v1509_v62 = vld [vmem:[%s2135_s4 + $0x4] sm:$0xf]  ;;  %v910_v63 = vpop.permute.xlu1 %909 }
 0x2bf   : > { %v764_v3 = vmax.f32 %v756_v1, 0.0 }
 0x2c0   : > { %v765_v6 = vmax.f32 %v757_v2, 0.0 }
 0x2c1   : > { %v784_v9 = vpack.c.bf16 %v764_v3, %v762_v7 }
 0x2c2   : > { %v785_v8 = vpack.c.bf16 %v765_v6, %v763_v5 }
 0x2c4   : > { %824 = vmatprep.subr.bf16.mxu1 %v785_v8 }
 0x2c5   : > { %825 = vmatpush1.bf16.msra.mxu1 %v784_v9 }
 0x2c8   : > { %1507 = vmatmul.mubr.msk.bf16.vlgmr.msra.gmra.mrb[8].mxu1 %vm466_vm1, %v1617_v10 }
 0x2c9   : > { %864 = vmatprep.mubr.bf16.mxu1 %v1693_v4 }
 0x2d0   : > { %1508 = vmatmul.mubr.msk.bf16.gmra.mrb[12].mxu1 %vm466_vm1, %v1618_v11 }
 0x2d1   : > { %1165 = vmatprep.mubr.bf16.mxu1 %v1693_v4 }
 0x39b   : > { %v856_v13 = vpop.f32.mrb[8].mxu1 }
 0x39c   : > { %v857_v14 = vadd.f32 %v856_v13, %v789_v12  ;;  %v858_v15 = vpop.f32.mrb[9].mxu1 }
 0x39d   : > { %v859_v17 = vadd.f32 %v858_v15, %v789_v12  ;;  %v860_v18 = vpop.f32.mrb[10].mxu1  ;;  %v1620_v15 = vld [vmem:[%s2137_s6 + $0x18] sm:$0xff]  }
 0x39e   : > { %v875_v19 = vmul.f32 %v857_v14, %v1910_v40  ;;  %v861_v20 = vadd.f32 %v860_v18, %v794_v16  ;;  %v862_v21 = vpop.f32.mrb[11].mxu1  ;;  %v1619_v14 = vld [vmem:[%s2137_s6 + $0x10] sm:$0xff]  }
 0x39f   : > { %v876_v22 = vmul.f32 %v859_v17, %v1882_v26  ;;  %v863_v23 = vadd.f32 %v862_v21, %v794_v16  ;;  %v975_v16 = vpop.permute.xlu0 %974 }
 0x3a0   : > { %v877_v24 = vmul.f32 %v861_v20, %v1910_v40  ;;  %v883_v28 = vmax.f32 %v875_v19, 0.0  ;;  %v980_v20 = vpop.permute.xlu1 %979 }
 0x3a1   : > { %v884_v25 = vmax.f32 %v876_v22, 0.0  ;;  %v878_v27 = vmul.f32 %v863_v23, %v1882_v26 }
 0x3a2   : > { %v885_v29 = vmax.f32 %v877_v24, 0.0  ;;  %v1985_v42 = vadd.f32 %v883_v28, %v758_v52 }
 0x3a3   : > { %v886_v31 = vmax.f32 %v878_v27, 0.0  ;;  %v866_v32 = vpop.f32.mrb[12].mxu1  ;;  %v1981_v37 = vadd.f32 %v884_v25, %v759_v49 }
 0x3a4   : > { %v1979_v33 = vadd.f32 %v885_v29, %v760_v47  ;;  %v867_v34 = vadd.f32 %v866_v32, %v799_v30  ;;  %v868_v35 = vpop.f32.mrb[13].mxu1 }
 0x3a5   : > { %v1983_v38 = vadd.f32 %v886_v31, %v761_v50  ;;  %v869_v39 = vadd.f32 %v868_v35, %v799_v30  ;;  %v870_v41 = vpop.f32.mrb[14].mxu1 }
 0x3a6   : > { %v879_v43 = vmul.f32 %v867_v34, %v1910_v40  ;;  %v871_v44 = vadd.f32 %v870_v41, %v804_v36  ;;  %v872_v45 = vpop.f32.mrb[15].mxu1  ;;  %v903_v49 = vpack.c.bf16 %v1979_v33, %v1985_v42  ;;  %v985_v34 = vpop.permute.xlu0 %984 }
 0x3a7   : > { %v880_v46 = vmul.f32 %v869_v39, %v1882_v26  ;;  %v873_v48 = vadd.f32 %v872_v45, %v804_v36  ;;  %v904_v47 = vpack.c.bf16 %v1983_v38, %v1981_v37  ;;  %v990_v45 = vpop.permute.xlu1 %989 }
 0x3a8   : > { %v881_v50 = vmul.f32 %v871_v44, %v1910_v40  ;;  %v887_v52 = vmax.f32 %v879_v43, 0.0 }
 0x3a9   : > { %v888_v51 = vmax.f32 %v880_v46, 0.0  ;;  %v882_v53 = vmul.f32 %v873_v48, %v1882_v26  ;;  %915 = vmatprep.subr.bf16.mxu0 %v904_v47 }
 0x3aa   : > { %v889_v54 = vmax.f32 %v881_v50, 0.0  ;;  %916 = vmatpush1.bf16.msra.mxu0 %v903_v49  ;;  %v2001_v59 = vadd.f32 %v887_v52, %v762_v7 }
 0x3ab   : > { %v890_v55 = vmax.f32 %v882_v53, 0.0  ;;  %v1997_v57 = vadd.f32 %v888_v51, %v763_v5 }
 0x3ac   : > { %v1995_v56 = vadd.f32 %v889_v54, %v764_v3 }
 0x3ad   : > { %v1999_v58 = vadd.f32 %v890_v55, %v765_v6 }
 0x3ae   : > { %v905_v61 = vpack.c.bf16 %v1995_v56, %v2001_v59 }
 0x3af   : > { %v906_v60 = vpack.c.bf16 %v1999_v58, %v1997_v57 }
 0x3b1   : > { %917 = vmatprep.subr.bf16.mxu0 %v906_v60 }
 0x3b2   : > { %918 = vmatpush1.bf16.msra.mxu0 %v905_v61 }
 0x3b5   : > { %1511 = vmatmul.mubr.msk.bf16.vlgmr.msra.gmra.mrb[12].mxu0 %vm466_vm1, %v1509_v62 }
 0x3b6   : > { %1046 = vmatprep.mubr.bf16.mxu0 %v1693_v4 }
 0x488   : > { %v949_v0 = vpop.f32.mrb[12].mxu0 }
 0x489   : > { %v950_v1 = vadd.f32 %v949_v0, %v910_v63  ;;  %v951_v2 = vpop.f32.mrb[13].mxu0 }
 0x48a   : > { %v952_v3 = vadd.f32 %v951_v2, %v910_v63  ;;  %v953_v5 = vpop.f32.mrb[14].mxu0  ;;  %v1621_v2 = vld [vmem:[%s2139_s8 + $0x10] sm:$0xff]  }
 0x48b   : > { %v956_v6 = vmul.f32 %v950_v1, %v1910_v40  ;;  %v954_v7 = vpop.f32.mrb[15].mxu0  ;;  %v1100_v5 = vpop.permute.xlu0 %1099 }
 0x48c   : > { %v957_v8 = vmul.f32 %v952_v3, %v1882_v26  ;;  %v1622_v3 = vld [vmem:[%s2139_s8 + $0x18] sm:$0xff]  }
 0x48d   : > { %v958_v9 = vmax.f32 %v956_v6, 0.0 }
 0x48e   : > { %v959_v10 = vmax.f32 %v957_v8, 0.0 }
 0x48f   : > { %v970_v11 = vpack.c.bf16 %v958_v9, %v958_v9  ;;  %v1105_v9 = vpop.permute.xlu1 %1104 }
 0x490   : > { %v971_v12 = vpack.c.bf16 %v959_v10, %v959_v10 }
 0x491   : > { %v1009_v13 = vsel %vm573_vm2, %v970_v11, 0 }
 0x492   : > { %1522 = vmatprep.subr.msk.bf16.mxu0 %vm573_vm2, %v971_v12 }
 0x493   : > { %1015 = vmatpush1.bf16.msra.mxu0 %v1009_v13 }
 0x496   : > { %1523 = vmatmul.mubr.msk.bf16.vlgmr.msra.gmra.mrb[16].mxu0 %vm566_vm3, %v1619_v14 }
 0x497   : > { %1056 = vmatprep.mubr.bf16.mxu0 %v1693_v4 }
 0x49e   : > { %1524 = vmatmul.mubr.msk.bf16.gmra.mrb[20].mxu0 %vm566_vm3, %v1620_v15 }
 0x49f   : > { %1292 = vmatprep.mubr.bf16.mxu0 %v1693_v4 }
 0x569   : > { %v1048_v17 = vpop.f32.mrb[16].mxu0 }
 0x56a   : > { %v1049_v18 = vadd.f32 %v1048_v17, %v975_v16  ;;  %v1050_v19 = vpop.f32.mrb[17].mxu0 }
 0x56b   : > { %v1051_v21 = vadd.f32 %v1050_v19, %v975_v16  ;;  %v1052_v22 = vpop.f32.mrb[18].mxu0 }
 0x56c   : > { %v1067_v23 = vmul.f32 %v1049_v18, %v1910_v40  ;;  %v1053_v24 = vadd.f32 %v1052_v22, %v980_v20  ;;  %v1054_v25 = vpop.f32.mrb[19].mxu0  ;;  %v1110_v22 = vpop.permute.xlu0 %1109 }
 0x56d   : > { %v1068_v27 = vmul.f32 %v1051_v21, %v1882_v26  ;;  %v1055_v28 = vadd.f32 %v1054_v25, %v980_v20 }
 0x56e   : > { %v1069_v29 = vmul.f32 %v1053_v24, %v1910_v40  ;;  %v1075_v31 = vmax.f32 %v1067_v23, 0.0 }
 0x56f   : > { %v1070_v30 = vmul.f32 %v1055_v28, %v1882_v26  ;;  %v1076_v35 = vmax.f32 %v1068_v27, 0.0 }
 0x570   : > { %v1077_v32 = vmax.f32 %v1069_v29, 0.0  ;;  %v1115_v29 = vpop.permute.xlu1 %1114 }
 0x571   : > { %v1078_v36 = vmax.f32 %v1070_v30, 0.0  ;;  %v1058_v39 = vpop.f32.mrb[20].mxu0 }
 0x572   : > { %v1093_v41 = vpack.c.bf16 %v1077_v32, %v1075_v31  ;;  %v1059_v43 = vadd.f32 %v1058_v39, %v985_v34  ;;  %v1060_v44 = vpop.f32.mrb[21].mxu0 }
 0x573   : > { %v1061_v46 = vadd.f32 %v1060_v44, %v985_v34  ;;  %v1062_v48 = vpop.f32.mrb[22].mxu0  ;;  %v1094_v47 = vpack.c.bf16 %v1078_v36, %v1076_v35 }
 0x574   : > { %v1071_v49 = vmul.f32 %v1059_v43, %v1910_v40  ;;  %v1063_v50 = vadd.f32 %v1062_v48, %v990_v45  ;;  %v1064_v51 = vpop.f32.mrb[23].mxu0 }
 0x575   : > { %v1072_v53 = vmul.f32 %v1061_v46, %v1882_v26  ;;  %v1065_v52 = vadd.f32 %v1064_v51, %v990_v45  ;;  %1133 = vmatprep.subr.bf16.mxu1 %v1094_v47 }
 0x576   : > { %v1073_v54 = vmul.f32 %v1063_v50, %v1910_v40  ;;  %1134 = vmatpush1.bf16.msra.mxu1 %v1093_v41  ;;  %v1079_v60 = vmax.f32 %v1071_v49, 0.0 }
 0x577   : > { %v1074_v55 = vmul.f32 %v1065_v52, %v1882_v26  ;;  %v1080_v62 = vmax.f32 %v1072_v53, 0.0 }
 0x578   : > { %v1081_v61 = vmax.f32 %v1073_v54, 0.0 }
 0x579   : > { %v1082_v63 = vmax.f32 %v1074_v55, 0.0  ;;  %v1623_v55 = vld [vmem:[%s2141_s10 + $0x10] sm:$0xff]  }
 0x57a   : > { %v1095_v0 = vpack.c.bf16 %v1081_v61, %v1079_v60  ;;  %v1232_v61 = vpop.permute.xlu1 %1231 }
 0x57b   : > { %v1096_v1 = vpack.c.bf16 %v1082_v63, %v1080_v62 }
 0x57d   : > { %1135 = vmatprep.subr.bf16.mxu1 %v1096_v1 }
 0x57e   : > { %1136 = vmatpush1.bf16.msra.mxu1 %v1095_v0 }
 0x581   : > { %1535 = vmatmul.mubr.msk.bf16.vlgmr.msra.gmra.mrb[16].mxu1 %vm466_vm1, %v1621_v2 }
 0x582   : > { %1175 = vmatprep.mubr.bf16.mxu1 %v1693_v4 }
 0x589   : > { %1536 = vmatmul.mubr.msk.bf16.gmra.mrb[20].mxu1 %vm466_vm1, %v1622_v3 }
 0x58a   : > { %1383 = vmatprep.mubr.bf16.mxu1 %v1693_v4 }
 0x654   : > { %v1167_v6 = vpop.f32.mrb[16].mxu1 }
 0x655   : > { %v1168_v7 = vadd.f32 %v1167_v6, %v1100_v5  ;;  %v1169_v8 = vpop.f32.mrb[17].mxu1 }
 0x656   : > { %v1170_v10 = vadd.f32 %v1169_v8, %v1100_v5  ;;  %v1171_v11 = vpop.f32.mrb[18].mxu1 }
 0x657   : > { %v1186_v12 = vmul.f32 %v1168_v7, %v1910_v40  ;;  %v1172_v13 = vadd.f32 %v1171_v11, %v1105_v9  ;;  %v1173_v14 = vpop.f32.mrb[19].mxu1 }
 0x658   : > { %v1187_v15 = vmul.f32 %v1170_v10, %v1882_v26  ;;  %v1174_v16 = vadd.f32 %v1173_v14, %v1105_v9 }
 0x659   : > { %v1188_v17 = vmul.f32 %v1172_v13, %v1910_v40  ;;  %v1194_v20 = vmax.f32 %v1186_v12, 0.0 }
 0x65a   : > { %v1195_v18 = vmax.f32 %v1187_v15, 0.0  ;;  %v1189_v19 = vmul.f32 %v1174_v16, %v1882_v26 }
 0x65b   : > { %v1196_v21 = vmax.f32 %v1188_v17, 0.0  ;;  %v1202_v35 = vadd.f32 %v1194_v20, %v1985_v42  ;;  %v1242_v17 = vpop.permute.xlu1 %1241 }
 0x65c   : > { %v1197_v23 = vmax.f32 %v1189_v19, 0.0  ;;  %v1177_v24 = vpop.f32.mrb[20].mxu1  ;;  %v1203_v30 = vadd.f32 %v1195_v18, %v1981_v37 }
 0x65d   : > { %v1204_v25 = vadd.f32 %v1196_v21, %v1979_v33  ;;  %v1178_v27 = vadd.f32 %v1177_v24, %v1110_v22  ;;  %v1179_v28 = vpop.f32.mrb[21].mxu1 }
 0x65e   : > { %v1205_v31 = vadd.f32 %v1197_v23, %v1983_v38  ;;  %v1180_v32 = vadd.f32 %v1179_v28, %v1110_v22  ;;  %v1181_v34 = vpop.f32.mrb[22].mxu1 }
 0x65f   : > { %v1190_v36 = vmul.f32 %v1178_v27, %v1910_v40  ;;  %v1182_v39 = vadd.f32 %v1181_v34, %v1115_v29  ;;  %v1183_v41 = vpop.f32.mrb[23].mxu1  ;;  %v1220_v33 = vpack.c.bf16 %v1204_v25, %v1202_v35 }
 0x660   : > { %v1191_v43 = vmul.f32 %v1180_v32, %v1882_v26  ;;  %v1184_v44 = vadd.f32 %v1183_v41, %v1115_v29  ;;  %v1221_v45 = vpack.c.bf16 %v1205_v31, %v1203_v30 }
 0x661   : > { %v1192_v46 = vmul.f32 %v1182_v39, %v1910_v40  ;;  %v1198_v38 = vmax.f32 %v1190_v36, 0.0 }
 0x662   : > { %v1199_v48 = vmax.f32 %v1191_v43, 0.0  ;;  %v1193_v37 = vmul.f32 %v1184_v44, %v1882_v26  ;;  %1260 = vmatprep.subr.bf16.mxu0 %v1221_v45 }
 0x663   : > { %v1200_v47 = vmax.f32 %v1192_v46, 0.0  ;;  %1261 = vmatpush1.bf16.msra.mxu0 %v1220_v33  ;;  %v1206_v53 = vadd.f32 %v1198_v38, %v2001_v59 }
 0x664   : > { %v1201_v49 = vmax.f32 %v1193_v37, 0.0  ;;  %v1207_v50 = vadd.f32 %v1199_v48, %v1997_v57  ;;  %v1227_v57 = vpop.permute.xlu0 %1226 }
 0x665   : > { %v1208_v42 = vadd.f32 %v1200_v47, %v1995_v56  ;;  %v1624_v56 = vld [vmem:[%s2141_s10 + $0x18] sm:$0xff]  }
 0x666   : > { %v1209_v51 = vadd.f32 %v1201_v49, %v1999_v58 }
 0x667   : > { %v1222_v54 = vpack.c.bf16 %v1208_v42, %v1206_v53 }
 0x668   : > { %v1223_v52 = vpack.c.bf16 %v1209_v51, %v1207_v50  ;;  %v1237_v10 = vpop.permute.xlu0 %1236 }
 0x66a   : > { %1262 = vmatprep.subr.bf16.mxu0 %v1223_v52 }
 0x66b   : > { %1263 = vmatpush1.bf16.msra.mxu0 %v1222_v54 }
 0x66e   : > { %1547 = vmatmul.mubr.msk.bf16.vlgmr.msra.gmra.mrb[24].mxu0 %vm466_vm1, %v1623_v55 }
 0x66f   : > { %1302 = vmatprep.mubr.bf16.mxu0 %v1693_v4 }
 0x676   : > { %1548 = vmatmul.mubr.msk.bf16.gmra.mrb[28].mxu0 %vm466_vm1, %v1624_v56 }
 0x741   : > { %v1294_v58 = vpop.f32.mrb[24].mxu0 }
 0x742   : > { %v1295_v59 = vadd.f32 %v1294_v58, %v1227_v57  ;;  %v1296_v60 = vpop.f32.mrb[25].mxu0 }
 0x743   : > { %v1297_v62 = vadd.f32 %v1296_v60, %v1227_v57  ;;  %v1298_v63 = vpop.f32.mrb[26].mxu0 }
 0x744   : > { %v1313_v0 = vmul.f32 %v1295_v59, %v1910_v40  ;;  %v1299_v1 = vadd.f32 %v1298_v63, %v1232_v61  ;;  %v1300_v2 = vpop.f32.mrb[27].mxu0 }
 0x745   : > { %v1314_v3 = vmul.f32 %v1297_v62, %v1882_v26  ;;  %v1301_v4 = vadd.f32 %v1300_v2, %v1232_v61 }
 0x746   : > { %v1321_v5 = vmax.f32 %v1313_v0, 0.0  ;;  %v1315_v6 = vmul.f32 %v1299_v1, %v1910_v40 }
 0x747   : > { %v1322_v7 = vmax.f32 %v1314_v3, 0.0  ;;  %v1316_v8 = vmul.f32 %v1301_v4, %v1882_v26 }
 0x748   : > { %v1323_v9 = vmax.f32 %v1315_v6, 0.0  ;;  %v1329_v13 = vadd.f32 %v1321_v5, %v1202_v35 }
 0x749   : > { %v1324_v11 = vmax.f32 %v1316_v8, 0.0  ;;  %v1304_v12 = vpop.f32.mrb[28].mxu0  ;;  %v1330_v18 = vadd.f32 %v1322_v7, %v1203_v30 }
 0x74a   : > { %v1331_v14 = vadd.f32 %v1323_v9, %v1204_v25  ;;  %v1305_v15 = vadd.f32 %v1304_v12, %v1237_v10  ;;  %v1306_v16 = vpop.f32.mrb[29].mxu0 }
 0x74b   : > { %v1332_v19 = vadd.f32 %v1324_v11, %v1205_v31  ;;  %v1307_v20 = vadd.f32 %v1306_v16, %v1237_v10  ;;  %v1308_v21 = vpop.f32.mrb[30].mxu0 }
 0x74c   : > { %v1339_v22 = vpack.c.bf16 %v1331_v14, %v1329_v13  ;;  %v1317_v23 = vmul.f32 %v1305_v15, %v1910_v40  ;;  %v1309_v24 = vadd.f32 %v1308_v21, %v1242_v17  ;;  %v1310_v27 = vpop.f32.mrb[31].mxu0 }
 0x74d   : > { %v1318_v28 = vmul.f32 %v1307_v20, %v1882_v26  ;;  %v1311_v29 = vadd.f32 %v1310_v27, %v1242_v17  ;;  %v1340_v32 = vpack.c.bf16 %v1332_v19, %v1330_v18 }
 0x74e   : > { %v1325_v34 = vmax.f32 %v1317_v23, 0.0  ;;  %v1319_v35 = vmul.f32 %v1309_v24, %v1910_v40  ;;  %v1625_v40 = vld [vmem:[%s2143_s12] sm:$0xff]  }
 0x74f   : > { %v1326_v25 = vmax.f32 %v1318_v28, 0.0  ;;  %v1320_v36 = vmul.f32 %v1311_v29, %v1882_v26  ;;  %1351 = vmatprep.subr.bf16.mxu1 %v1340_v32 }
 0x750   : > { %v1327_v30 = vmax.f32 %v1319_v35, 0.0  ;;  %1352 = vmatpush1.bf16.msra.mxu1 %v1339_v22  ;;  %v1333_v39 = vadd.f32 %v1325_v34, %v1206_v53 }
 0x751   : > { %v1328_v31 = vmax.f32 %v1320_v36, 0.0  ;;  %v1334_v43 = vadd.f32 %v1326_v25, %v1207_v50 }
 0x752   : > { %v1335_v41 = vadd.f32 %v1327_v30, %v1208_v42 }
 0x753   : > { %v1336_v44 = vadd.f32 %v1328_v31, %v1209_v51 }
 0x754   : > { %v1341_v45 = vpack.c.bf16 %v1335_v41, %v1333_v39 }
 0x755   : > { %v1342_v33 = vpack.c.bf16 %v1336_v44, %v1334_v43 }
 0x757   : > { %1353 = vmatprep.subr.bf16.mxu1 %v1342_v33 }
 0x758   : > { %1354 = vmatpush1.bf16.msra.mxu1 %v1341_v45 }
 0x75b   : > { %1550 = vmatmul.mubr.msk.bf16.vlgmr.msra.gmra.mrb[24].mxu1 %vm466_vm1, %v1625_v40 }
 0x82e   : > { %v1385_v26 = vpop.f32.mrb[24].mxu1 }
 0x82f   : > { %v1394_v46 = vmax.f32 %v1385_v26, 0.0  ;;  %v1387_v48 = vpop.f32.mrb[25].mxu1 }
 0x830   : > { %v1395_v37 = vmax.f32 %v1387_v48, 0.0  ;;  %v1389_v38 = vpop.f32.mrb[26].mxu1 }
 0x831   : > { %1398 = vst [vmem:[%s446_s3] sm:$0xff] %v1394_v46  ;;  %v1396_v47 = vmax.f32 %v1389_v38, 0.0  ;;  %v1391_v49 = vpop.f32.mrb[27].mxu1 }
 0x832   : > { %1399 = vst [vmem:[%s446_s3 + $0x8] sm:$0xff] %v1395_v37  ;;  %v1397_v42 = vmax.f32 %v1391_v49, 0.0 }
 0x833   : > { %1400 = vst [vmem:[%s446_s3 + $0x10] sm:$0xff] %v1396_v47 }
 0x834   : > { %1401 = vst [vmem:[%s446_s3 + $0x18] sm:$0xff] %v1397_v42 }
 0x835   : > { %1639 = shalt.err (!%p1636_p3)
}
 0x836   : > { %s1640_s29 = scalar_lea.hbm %s2088_s20, 512  ;;  %s1644_s18 = scalar_lea.hbm %s2144_s13, 1024 }
 0x837   : > { %p1641_p4 = scmp.ne.s32.totalorder %s2088_s20, %s1640_s29  ;;  %p1645_p9 = scmp.lt.u32.totalorder %s2088_s20, %s2144_s13 }
 0x838   : > { %p1646_p10 = scmp.lt.u32.totalorder %s1644_s18, %s1640_s29  ;;  %p1648_p12 = scmp.lt.u32.totalorder %s1640_s29, %s2088_s20 }
 0x839   : > { %p1642_p7 = pnand %p1641_p4, %p1805_p5 }
 0x83a   : > { %p1647_p11 = por %p1646_p10, %p1645_p9 }
 0x83b   : > { %p1643_p8 = pneg %p1642_p7 }
 0x83c   : > { %p1649_p13 = por %p1648_p12, %p1647_p11 }
 0x83e   : > { %p1650_p0 = pnand %p1649_p13, %p1643_p8 }
 0x840   : > { %1653 = shalt.err (!%p1650_p0)
}
 0x841   : > { %s1695_s21 = smov 256   ;;  %s1696_s0 = smov 16  }
 0x842   : > { %1566 = dma.vmem_to_hbm [thread:$0]  (%p1805_p5), %s2083_s16, 512, %s2088_s20, %s2090_s26, %s1695_s21, %s1695_s21, %s1696_s0  }
 0x843 PF: > { %p1572_p1 = scmp.ge.s32.totalorder %s1688_s25, 2  ;;  %s1431_s15 = sand.u32 1, %s1676_s22  }
 0x844   : > { %s1432_s29 = scalar_lea.sflag [#allocation3], %s1431_s15 }
 0x845   : > { %p1569_p2 = pnand %p1572_p1, %p1809_p6 }
 0x847   : > { %1671 = dma.done.wait (!%p1569_p2), %s1432_s29, 512  }
 0x848   : > { %1673 = vsyncadd (!%p1569_p2), %s1432_s29, 4294966784  ;;  %p23_p3 = scmp.ge.s32.totalorder %s1792_s28, 4   ;;  %s2147_s22 = smov %s1680_s23 }
 0x849   : > { %s2148_s23 = smov %s1684_s24  ;;  %s2149_s24 = smov %s1803_s30 }
 0x84a   : > { %s2150_s25 = smov %s1792_s28  ;;  %25 = sbr.rel (!%p23_p3) target bundleno = 3 (0x3), region = 118 }
 0x851   :  { %1437 = vsyncpa [#allocation3], 1 }
 0x852   :  { %1439 = vsyncpa [#allocation3 + $0x1], 1 }

</bundles_post_ra>
